<compile_context>
chip_gen: v6e
topology: v6e:2x2x1
jax: 0.10.0
libtpu: 0.0.40
codegen_flags: <defaults>
</compile_context>

<pallas_src>
import functools

import jax
import jax.numpy as jnp
from jax.experimental import pallas as pl
from jax.experimental.pallas import tpu as pltpu


# ----------------------------------------------------------------------------
# Fused kernel: block-diag projections + per-head attention + fc_out
# ----------------------------------------------------------------------------
def _fused_attn_kernel(q_ref, k_ref, v_ref, bias_ref,
                       wq_ref, wk_ref, wv_ref, wfc_ref, bfc_ref,
                       o_ref, *, heads, head_dim, mxu_dtype):
    f32 = jnp.float32

    q = q_ref[0]        # (Tq, E)
    k = k_ref[0]        # (Lk, E)
    v = v_ref[0]        # (Lv, E)
    bias = bias_ref[0]  # (Tq, Lk) additive f32 (-1e20/sqrt(E) where masked, else 0)

    def mm(a, b):
        # MXU matmul with selectable input dtype, always f32 accumulation.
        return jnp.dot(a.astype(mxu_dtype), b.astype(mxu_dtype),
                       preferred_element_type=f32)

    # Block-diagonal per-head projections: (L, E) @ (E, E), lane-dense,
    # contraction = E.  1/sqrt(embed_size) is already folded into wq_ref.
    qp = mm(q, wq_ref[...])     # (Tq, E), pre-scaled
    kp = mm(k, wk_ref[...])     # (Lk, E)
    vp = mm(v, wv_ref[...])     # (Lv, E)

    tq = q.shape[0]
    acc = jnp.zeros((tq, heads * head_dim), f32)

    # Per-head attention; fc_out is fused by decomposing it over head blocks:
    #   out = concat_h(ctx_h) @ Wfc.T + b = sum_h ctx_h @ Wfc.T[hD:(h+1)D, :] + b
    for h in range(heads):
        s0 = h * head_dim
        qh = qp[:, s0:s0 + head_dim]            # (Tq, D)
        kh = kp[:, s0:s0 + head_dim]            # (Lk, D)
        vh = vp[:, s0:s0 + head_dim]            # (Lv, D)

        s = mm(qh, kh.T) + bias                  # (Tq, Lk), already scaled
        m = jnp.max(s, axis=-1, keepdims=True)
        e = jnp.exp(s - m)                       # f32 softmax math
        p = e * pl.reciprocal(jnp.sum(e, axis=-1, keepdims=True), approx=True)

        ctx = mm(p, vh)                          # (Tq, D)
        acc = acc + mm(ctx, wfc_ref[s0:s0 + head_dim, :])   # (Tq, E)

    o_ref[0] = (acc + bfc_ref[...]).astype(o_ref.dtype)      # lane-dense store


# ----------------------------------------------------------------------------
# One-time parameter preparation (transposes, block-diagonal, scale folding)
# ----------------------------------------------------------------------------
def prepare_params(params, *, embed_size, heads):
    head_dim = embed_size // heads
    assert head_dim * heads == embed_size
    scale = jnp.float32(1.0 / (embed_size ** 0.5))
    eye = jnp.eye(heads, dtype=jnp.float32)

    def block_diag_t(w):  # nn.Linear weight (out,in) -> block-diag of w.T, (E, E)
        return jnp.kron(eye, w.T.astype(jnp.float32))

    return {
        "wq_bd": block_diag_t(params["w_queries"]) * scale,   # scale folded in
        "wk_bd": block_diag_t(params["w_keys"]),
        "wv_bd": block_diag_t(params["w_values"]),
        "wfc_t": params["w_fc"].T.astype(jnp.float32),        # (E, E)
        "b_fc":  params["b_fc"].reshape(1, embed_size).astype(jnp.float32),
    }


# ----------------------------------------------------------------------------
# Module-equivalent forward
# ----------------------------------------------------------------------------
def self_attention_forward(prepared, values, keys, query, mask, *,
                           embed_size, heads, q_block=None,
                           mxu_dtype=jnp.float32):
    """Matches SelfAttention.forward semantics.

    values/keys/query: (N, L, embed_size) float32
    mask: (N, 1, Lq, Lk) (0 -> masked, broadcast over heads) or None.
    """
    head_dim = embed_size // heads
    E = embed_size
    N, q_len, _ = query.shape
    k_len = keys.shape[1]
    v_len = values.shape[1]
    assert k_len == v_len, "key_len must equal value_len"

    scale = 1.0 / (embed_size ** 0.5)
    if mask is None:
        bias = jnp.zeros((N, q_len, k_len), jnp.float32)
    else:
        # Additive bias; -1e20*scale absorbs any finite scaled energy in f32,
        # so this reproduces masked_fill(-1e20) followed by /sqrt(E) exactly.
        bias = jnp.where(mask.reshape(N, q_len, k_len) == 0,
                         jnp.float32(-1e20 * scale), jnp.float32(0.0))

    if q_block is None:
        q_block = q_len
    assert q_len % q_block == 0
    n_q = q_len // q_block

    kernel = functools.partial(_fused_attn_kernel, heads=heads,
                               head_dim=head_dim, mxu_dtype=mxu_dtype)

    return pl.pallas_call(
        kernel,
        out_shape=jax.ShapeDtypeStruct((N, q_len, E), jnp.float32),
        grid_spec=pltpu.PrefetchScalarGridSpec(
            num_scalar_prefetch=0,
            grid=(N, n_q),
            in_specs=[
                pl.BlockSpec((1, q_block, E), lambda n, qi: (n, qi, 0)),   # query
                pl.BlockSpec((1, k_len, E), lambda n, qi: (n, 0, 0)),      # keys
                pl.BlockSpec((1, v_len, E), lambda n, qi: (n, 0, 0)),      # values
                pl.BlockSpec((1, q_block, k_len), lambda n, qi: (n, qi, 0)),  # bias
                pl.BlockSpec((E, E), lambda n, qi: (0, 0)),                # wq_bd
                pl.BlockSpec((E, E), lambda n, qi: (0, 0)),                # wk_bd
                pl.BlockSpec((E, E), lambda n, qi: (0, 0)),                # wv_bd
                pl.BlockSpec((E, E), lambda n, qi: (0, 0)),                # wfc_t
                pl.BlockSpec((1, E), lambda n, qi: (0, 0)),                # b_fc
            ],
            out_specs=pl.BlockSpec((1, q_block, E), lambda n, qi: (n, qi, 0)),
        ),
        compiler_params=pltpu.CompilerParams(
            dimension_semantics=("parallel", "parallel")),
    )(query, keys, values, bias,
      prepared["wq_bd"], prepared["wk_bd"], prepared["wv_bd"],
      prepared["wfc_t"], prepared["b_fc"])


# ----------------------------------------------------------------------------
# Pure-JAX reference (mirrors the PyTorch forward) for a sanity check
# ----------------------------------------------------------------------------
def self_attention_reference(params, values, keys, query, mask, *, embed_size, heads):
    head_dim = embed_size // heads
    N, q_len, _ = query.shape
    v_len, k_len = values.shape[1], keys.shape[1]
    v = values.reshape(N, v_len, heads, head_dim) @ params["w_values"].T
    k = keys.reshape(N, k_len, heads, head_dim) @ params["w_keys"].T
    q = query.reshape(N, q_len, heads, head_dim) @ params["w_queries"].T
    energy = jnp.einsum("nqhd,nkhd->nhqk", q, k)
    if mask is not None:
        energy = jnp.where(mask == 0, jnp.float32(-1e20), energy)
    attn = jax.nn.softmax(energy / (embed_size ** 0.5), axis=3)
    out = jnp.einsum("nhql,nlhd->nqhd", attn, v).reshape(N, q_len, heads * head_dim)
    return out @ params["w_fc"].T + params["b_fc"]


if __name__ == "__main__":
    embed_size = 32
    heads = 4
    head_dim = embed_size // heads
    N, seq = 2, 8

    key = jax.random.PRNGKey(0)
    ks = jax.random.split(key, 8)

    params = {
        "w_values":  0.1 * jax.random.normal(ks[0], (head_dim, head_dim), jnp.float32),
        "w_keys":    0.1 * jax.random.normal(ks[1], (head_dim, head_dim), jnp.float32),
        "w_queries": 0.1 * jax.random.normal(ks[2], (head_dim, head_dim), jnp.float32),
        "w_fc":      0.1 * jax.random.normal(ks[3], (embed_size, embed_size), jnp.float32),
        "b_fc":      0.1 * jax.random.normal(ks[4], (embed_size,), jnp.float32),
    }

    values = jax.random.normal(ks[5], (N, seq, embed_size), jnp.float32)
    keys_in = jax.random.normal(ks[6], (N, seq, embed_size), jnp.float32)
    query = jax.random.normal(ks[7], (N, seq, embed_size), jnp.float32)

    # causal-style mask, broadcast over heads (N, 1, Lq, Lk), int32, 0 = masked
    mask = jnp.tril(jnp.ones((seq, seq), jnp.int32))[None, None, :, :]
    mask = jnp.broadcast_to(mask, (N, 1, seq, seq))

    prepared = prepare_params(params, embed_size=embed_size, heads=heads)

    # NOTE: on v6e/v7x pass mxu_dtype=jnp.bfloat16 for ~2x MXU throughput
    # (f32 accumulation + f32 softmax are kept either way).
    out = self_attention_forward(prepared, values, keys_in, query, mask,
                                 embed_size=embed_size, heads=heads,
                                 mxu_dtype=jnp.float32)
    out = jax.block_until_ready(out)

    ref = self_attention_reference(params, values, keys_in, query, mask,
                                   embed_size=embed_size, heads=heads)
    assert out.shape == (N, seq, embed_size)
    assert jnp.allclose(out, ref, rtol=2e-2, atol=2e-3), "mismatch vs reference"

    print("KERNEL_OK")
</pallas_src>

<mosaic_0001>
module attributes {stable_mosaic.version = 11 : i64} {
  func.func @_fused_attn_kernel(%arg0: i32, %arg1: i32, %arg2: memref<1x8x32xf32, #tpu.memory_space<vmem>>, %arg3: memref<1x8x32xf32, #tpu.memory_space<vmem>>, %arg4: memref<1x8x32xf32, #tpu.memory_space<vmem>>, %arg5: memref<1x8x8xf32, #tpu.memory_space<vmem>>, %arg6: memref<32x32xf32, #tpu.memory_space<vmem>>, %arg7: memref<32x32xf32, #tpu.memory_space<vmem>>, %arg8: memref<32x32xf32, #tpu.memory_space<vmem>>, %arg9: memref<32x32xf32, #tpu.memory_space<vmem>>, %arg10: memref<1x32xf32, #tpu.memory_space<vmem>>, %arg11: memref<1x8x32xf32, #tpu.memory_space<vmem>>) attributes {dimension_semantics = [#tpu.dimension_semantics<parallel>, #tpu.dimension_semantics<parallel>], iteration_bounds = array<i64: 2, 1>, scalar_prefetch = 0 : i64, scratch_operands = 0 : i64, tpu.core_type = #tpu.core_type<tc>, window_params = [{transform_indices = @transform_0, window_bounds = array<i64: 1, 8, 32>}, {transform_indices = @transform_1, window_bounds = array<i64: 1, 8, 32>}, {transform_indices = @transform_2, window_bounds = array<i64: 1, 8, 32>}, {transform_indices = @transform_3, window_bounds = array<i64: 1, 8, 8>}, {pipeline_mode = #tpu.pipeline_mode<synchronous>, transform_indices = @transform_4, window_bounds = array<i64: 32, 32>}, {pipeline_mode = #tpu.pipeline_mode<synchronous>, transform_indices = @transform_5, window_bounds = array<i64: 32, 32>}, {pipeline_mode = #tpu.pipeline_mode<synchronous>, transform_indices = @transform_6, window_bounds = array<i64: 32, 32>}, {pipeline_mode = #tpu.pipeline_mode<synchronous>, transform_indices = @transform_7, window_bounds = array<i64: 32, 32>}, {pipeline_mode = #tpu.pipeline_mode<synchronous>, transform_indices = @transform_8, window_bounds = array<i64: 1, 32>}, {transform_indices = @transform_9, window_bounds = array<i64: 1, 8, 32>}]} {
    %c0 = arith.constant 0 : index
    %c0_0 = arith.constant 0 : index
    %c0_1 = arith.constant 0 : index
    %0 = vector.load %arg2[%c0, %c0_0, %c0_1] : memref<1x8x32xf32, #tpu.memory_space<vmem>>, vector<1x8x32xf32>
    %1 = vector.shape_cast %0 : vector<1x8x32xf32> to vector<8x32xf32>
    %c0_2 = arith.constant 0 : index
    %c0_3 = arith.constant 0 : index
    %c0_4 = arith.constant 0 : index
    %2 = vector.load %arg3[%c0_2, %c0_3, %c0_4] : memref<1x8x32xf32, #tpu.memory_space<vmem>>, vector<1x8x32xf32>
    %3 = vector.shape_cast %2 : vector<1x8x32xf32> to vector<8x32xf32>
    %c0_5 = arith.constant 0 : index
    %c0_6 = arith.constant 0 : index
    %c0_7 = arith.constant 0 : index
    %4 = vector.load %arg4[%c0_5, %c0_6, %c0_7] : memref<1x8x32xf32, #tpu.memory_space<vmem>>, vector<1x8x32xf32>
    %5 = vector.shape_cast %4 : vector<1x8x32xf32> to vector<8x32xf32>
    %c0_8 = arith.constant 0 : index
    %c0_9 = arith.constant 0 : index
    %c0_10 = arith.constant 0 : index
    %6 = vector.load %arg5[%c0_8, %c0_9, %c0_10] : memref<1x8x8xf32, #tpu.memory_space<vmem>>, vector<1x8x8xf32>
    %7 = vector.shape_cast %6 : vector<1x8x8xf32> to vector<8x8xf32>
    %c0_11 = arith.constant 0 : index
    %c0_12 = arith.constant 0 : index
    %8 = vector.load %arg6[%c0_11, %c0_12] : memref<32x32xf32, #tpu.memory_space<vmem>>, vector<32x32xf32>
    %cst = arith.constant dense<0.000000e+00> : vector<8x32xf32>
    %9 = tpu.matmul %1, %8, %cst {dimension_numbers = #tpu.dot_dimension_numbers<[1], [0], [0], [1], [0, 0, 1, 1], [], []>} : vector<8x32xf32>, vector<32x32xf32>, vector<8x32xf32> -> vector<8x32xf32>
    %c0_13 = arith.constant 0 : index
    %c0_14 = arith.constant 0 : index
    %10 = vector.load %arg7[%c0_13, %c0_14] : memref<32x32xf32, #tpu.memory_space<vmem>>, vector<32x32xf32>
    %cst_15 = arith.constant dense<0.000000e+00> : vector<8x32xf32>
    %11 = tpu.matmul %3, %10, %cst_15 {dimension_numbers = #tpu.dot_dimension_numbers<[1], [0], [0], [1], [0, 0, 1, 1], [], []>} : vector<8x32xf32>, vector<32x32xf32>, vector<8x32xf32> -> vector<8x32xf32>
    %c0_16 = arith.constant 0 : index
    %c0_17 = arith.constant 0 : index
    %12 = vector.load %arg8[%c0_16, %c0_17] : memref<32x32xf32, #tpu.memory_space<vmem>>, vector<32x32xf32>
    %cst_18 = arith.constant dense<0.000000e+00> : vector<8x32xf32>
    %13 = tpu.matmul %5, %12, %cst_18 {dimension_numbers = #tpu.dot_dimension_numbers<[1], [0], [0], [1], [0, 0, 1, 1], [], []>} : vector<8x32xf32>, vector<32x32xf32>, vector<8x32xf32> -> vector<8x32xf32>
    %cst_19 = arith.constant 0.000000e+00 : f32
    %14 = vector.broadcast %cst_19 : f32 to vector<8x32xf32>
    %15 = vector.extract_strided_slice %9 {offsets = [0, 0], sizes = [8, 8], strides = [1, 1]} : vector<8x32xf32> to vector<8x8xf32>
    %16 = vector.extract_strided_slice %11 {offsets = [0, 0], sizes = [8, 8], strides = [1, 1]} : vector<8x32xf32> to vector<8x8xf32>
    %17 = vector.extract_strided_slice %13 {offsets = [0, 0], sizes = [8, 8], strides = [1, 1]} : vector<8x32xf32> to vector<8x8xf32>
    %18 = tpu.transpose %16, [1, 0] : vector<8x8xf32> -> vector<8x8xf32>
    %cst_20 = arith.constant dense<0.000000e+00> : vector<8x8xf32>
    %19 = tpu.matmul %15, %18, %cst_20 {dimension_numbers = #tpu.dot_dimension_numbers<[1], [0], [0], [1], [0, 0, 1, 1], [], []>} : vector<8x8xf32>, vector<8x8xf32>, vector<8x8xf32> -> vector<8x8xf32>
    %20 = arith.addf %19, %7 : vector<8x8xf32>
    %cst_21 = arith.constant dense<0xFF800000> : vector<8xf32>
    %21 = vector.multi_reduction <maximumf>, %20, %cst_21 [1] : vector<8x8xf32> to vector<8xf32>
    %22 = vector.shape_cast %21 : vector<8xf32> to vector<8x1xf32>
    %23 = vector.broadcast %22 : vector<8x1xf32> to vector<8x8xf32>
    %24 = arith.subf %20, %23 : vector<8x8xf32>
    %25 = math.exp %24 : vector<8x8xf32>
    %cst_22 = arith.constant dense<0.000000e+00> : vector<8xf32>
    %26 = vector.multi_reduction <add>, %25, %cst_22 [1] : vector<8x8xf32> to vector<8xf32>
    %27 = vector.shape_cast %26 : vector<8xf32> to vector<8x1xf32>
    %28 = tpu.reciprocal %27 {approx = true} : vector<8x1xf32> -> vector<8x1xf32>
    %29 = vector.broadcast %28 : vector<8x1xf32> to vector<8x8xf32>
    %30 = arith.mulf %25, %29 : vector<8x8xf32>
    %cst_23 = arith.constant dense<0.000000e+00> : vector<8x8xf32>
    %31 = tpu.matmul %30, %17, %cst_23 {dimension_numbers = #tpu.dot_dimension_numbers<[1], [0], [0], [1], [0, 0, 1, 1], [], []>} : vector<8x8xf32>, vector<8x8xf32>, vector<8x8xf32> -> vector<8x8xf32>
    %c0_24 = arith.constant 0 : index
    %c0_25 = arith.constant 0 : index
    %32 = vector.load %arg9[%c0_24, %c0_25] : memref<32x32xf32, #tpu.memory_space<vmem>>, vector<8x32xf32>
    %cst_26 = arith.constant dense<0.000000e+00> : vector<8x32xf32>
    %33 = tpu.matmul %31, %32, %cst_26 {dimension_numbers = #tpu.dot_dimension_numbers<[1], [0], [0], [1], [0, 0, 1, 1], [], []>} : vector<8x8xf32>, vector<8x32xf32>, vector<8x32xf32> -> vector<8x32xf32>
    %34 = arith.addf %14, %33 : vector<8x32xf32>
    %35 = vector.extract_strided_slice %9 {offsets = [0, 8], sizes = [8, 8], strides = [1, 1]} : vector<8x32xf32> to vector<8x8xf32>
    %36 = vector.extract_strided_slice %11 {offsets = [0, 8], sizes = [8, 8], strides = [1, 1]} : vector<8x32xf32> to vector<8x8xf32>
    %37 = vector.extract_strided_slice %13 {offsets = [0, 8], sizes = [8, 8], strides = [1, 1]} : vector<8x32xf32> to vector<8x8xf32>
    %38 = tpu.transpose %36, [1, 0] : vector<8x8xf32> -> vector<8x8xf32>
    %cst_27 = arith.constant dense<0.000000e+00> : vector<8x8xf32>
    %39 = tpu.matmul %35, %38, %cst_27 {dimension_numbers = #tpu.dot_dimension_numbers<[1], [0], [0], [1], [0, 0, 1, 1], [], []>} : vector<8x8xf32>, vector<8x8xf32>, vector<8x8xf32> -> vector<8x8xf32>
    %40 = arith.addf %39, %7 : vector<8x8xf32>
    %cst_28 = arith.constant dense<0xFF800000> : vector<8xf32>
    %41 = vector.multi_reduction <maximumf>, %40, %cst_28 [1] : vector<8x8xf32> to vector<8xf32>
    %42 = vector.shape_cast %41 : vector<8xf32> to vector<8x1xf32>
    %43 = vector.broadcast %42 : vector<8x1xf32> to vector<8x8xf32>
    %44 = arith.subf %40, %43 : vector<8x8xf32>
    %45 = math.exp %44 : vector<8x8xf32>
    %cst_29 = arith.constant dense<0.000000e+00> : vector<8xf32>
    %46 = vector.multi_reduction <add>, %45, %cst_29 [1] : vector<8x8xf32> to vector<8xf32>
    %47 = vector.shape_cast %46 : vector<8xf32> to vector<8x1xf32>
    %48 = tpu.reciprocal %47 {approx = true} : vector<8x1xf32> -> vector<8x1xf32>
    %49 = vector.broadcast %48 : vector<8x1xf32> to vector<8x8xf32>
    %50 = arith.mulf %45, %49 : vector<8x8xf32>
    %cst_30 = arith.constant dense<0.000000e+00> : vector<8x8xf32>
    %51 = tpu.matmul %50, %37, %cst_30 {dimension_numbers = #tpu.dot_dimension_numbers<[1], [0], [0], [1], [0, 0, 1, 1], [], []>} : vector<8x8xf32>, vector<8x8xf32>, vector<8x8xf32> -> vector<8x8xf32>
    %c8 = arith.constant 8 : index
    %c0_31 = arith.constant 0 : index
    %52 = vector.load %arg9[%c8, %c0_31] : memref<32x32xf32, #tpu.memory_space<vmem>>, vector<8x32xf32>
    %cst_32 = arith.constant dense<0.000000e+00> : vector<8x32xf32>
    %53 = tpu.matmul %51, %52, %cst_32 {dimension_numbers = #tpu.dot_dimension_numbers<[1], [0], [0], [1], [0, 0, 1, 1], [], []>} : vector<8x8xf32>, vector<8x32xf32>, vector<8x32xf32> -> vector<8x32xf32>
    %54 = arith.addf %34, %53 : vector<8x32xf32>
    %55 = vector.extract_strided_slice %9 {offsets = [0, 16], sizes = [8, 8], strides = [1, 1]} : vector<8x32xf32> to vector<8x8xf32>
    %56 = vector.extract_strided_slice %11 {offsets = [0, 16], sizes = [8, 8], strides = [1, 1]} : vector<8x32xf32> to vector<8x8xf32>
    %57 = vector.extract_strided_slice %13 {offsets = [0, 16], sizes = [8, 8], strides = [1, 1]} : vector<8x32xf32> to vector<8x8xf32>
    %58 = tpu.transpose %56, [1, 0] : vector<8x8xf32> -> vector<8x8xf32>
    %cst_33 = arith.constant dense<0.000000e+00> : vector<8x8xf32>
    %59 = tpu.matmul %55, %58, %cst_33 {dimension_numbers = #tpu.dot_dimension_numbers<[1], [0], [0], [1], [0, 0, 1, 1], [], []>} : vector<8x8xf32>, vector<8x8xf32>, vector<8x8xf32> -> vector<8x8xf32>
    %60 = arith.addf %59, %7 : vector<8x8xf32>
    %cst_34 = arith.constant dense<0xFF800000> : vector<8xf32>
    %61 = vector.multi_reduction <maximumf>, %60, %cst_34 [1] : vector<8x8xf32> to vector<8xf32>
    %62 = vector.shape_cast %61 : vector<8xf32> to vector<8x1xf32>
    %63 = vector.broadcast %62 : vector<8x1xf32> to vector<8x8xf32>
    %64 = arith.subf %60, %63 : vector<8x8xf32>
    %65 = math.exp %64 : vector<8x8xf32>
    %cst_35 = arith.constant dense<0.000000e+00> : vector<8xf32>
    %66 = vector.multi_reduction <add>, %65, %cst_35 [1] : vector<8x8xf32> to vector<8xf32>
    %67 = vector.shape_cast %66 : vector<8xf32> to vector<8x1xf32>
    %68 = tpu.reciprocal %67 {approx = true} : vector<8x1xf32> -> vector<8x1xf32>
    %69 = vector.broadcast %68 : vector<8x1xf32> to vector<8x8xf32>
    %70 = arith.mulf %65, %69 : vector<8x8xf32>
    %cst_36 = arith.constant dense<0.000000e+00> : vector<8x8xf32>
    %71 = tpu.matmul %70, %57, %cst_36 {dimension_numbers = #tpu.dot_dimension_numbers<[1], [0], [0], [1], [0, 0, 1, 1], [], []>} : vector<8x8xf32>, vector<8x8xf32>, vector<8x8xf32> -> vector<8x8xf32>
    %c16 = arith.constant 16 : index
    %c0_37 = arith.constant 0 : index
    %72 = vector.load %arg9[%c16, %c0_37] : memref<32x32xf32, #tpu.memory_space<vmem>>, vector<8x32xf32>
    %cst_38 = arith.constant dense<0.000000e+00> : vector<8x32xf32>
    %73 = tpu.matmul %71, %72, %cst_38 {dimension_numbers = #tpu.dot_dimension_numbers<[1], [0], [0], [1], [0, 0, 1, 1], [], []>} : vector<8x8xf32>, vector<8x32xf32>, vector<8x32xf32> -> vector<8x32xf32>
    %74 = arith.addf %54, %73 : vector<8x32xf32>
    %75 = vector.extract_strided_slice %9 {offsets = [0, 24], sizes = [8, 8], strides = [1, 1]} : vector<8x32xf32> to vector<8x8xf32>
    %76 = vector.extract_strided_slice %11 {offsets = [0, 24], sizes = [8, 8], strides = [1, 1]} : vector<8x32xf32> to vector<8x8xf32>
    %77 = vector.extract_strided_slice %13 {offsets = [0, 24], sizes = [8, 8], strides = [1, 1]} : vector<8x32xf32> to vector<8x8xf32>
    %78 = tpu.transpose %76, [1, 0] : vector<8x8xf32> -> vector<8x8xf32>
    %cst_39 = arith.constant dense<0.000000e+00> : vector<8x8xf32>
    %79 = tpu.matmul %75, %78, %cst_39 {dimension_numbers = #tpu.dot_dimension_numbers<[1], [0], [0], [1], [0, 0, 1, 1], [], []>} : vector<8x8xf32>, vector<8x8xf32>, vector<8x8xf32> -> vector<8x8xf32>
    %80 = arith.addf %79, %7 : vector<8x8xf32>
    %cst_40 = arith.constant dense<0xFF800000> : vector<8xf32>
    %81 = vector.multi_reduction <maximumf>, %80, %cst_40 [1] : vector<8x8xf32> to vector<8xf32>
    %82 = vector.shape_cast %81 : vector<8xf32> to vector<8x1xf32>
    %83 = vector.broadcast %82 : vector<8x1xf32> to vector<8x8xf32>
    %84 = arith.subf %80, %83 : vector<8x8xf32>
    %85 = math.exp %84 : vector<8x8xf32>
    %cst_41 = arith.constant dense<0.000000e+00> : vector<8xf32>
    %86 = vector.multi_reduction <add>, %85, %cst_41 [1] : vector<8x8xf32> to vector<8xf32>
    %87 = vector.shape_cast %86 : vector<8xf32> to vector<8x1xf32>
    %88 = tpu.reciprocal %87 {approx = true} : vector<8x1xf32> -> vector<8x1xf32>
    %89 = vector.broadcast %88 : vector<8x1xf32> to vector<8x8xf32>
    %90 = arith.mulf %85, %89 : vector<8x8xf32>
    %cst_42 = arith.constant dense<0.000000e+00> : vector<8x8xf32>
    %91 = tpu.matmul %90, %77, %cst_42 {dimension_numbers = #tpu.dot_dimension_numbers<[1], [0], [0], [1], [0, 0, 1, 1], [], []>} : vector<8x8xf32>, vector<8x8xf32>, vector<8x8xf32> -> vector<8x8xf32>
    %c24 = arith.constant 24 : index
    %c0_43 = arith.constant 0 : index
    %92 = vector.load %arg9[%c24, %c0_43] : memref<32x32xf32, #tpu.memory_space<vmem>>, vector<8x32xf32>
    %cst_44 = arith.constant dense<0.000000e+00> : vector<8x32xf32>
    %93 = tpu.matmul %91, %92, %cst_44 {dimension_numbers = #tpu.dot_dimension_numbers<[1], [0], [0], [1], [0, 0, 1, 1], [], []>} : vector<8x8xf32>, vector<8x32xf32>, vector<8x32xf32> -> vector<8x32xf32>
    %94 = arith.addf %74, %93 : vector<8x32xf32>
    %c0_45 = arith.constant 0 : index
    %c0_46 = arith.constant 0 : index
    %95 = vector.load %arg10[%c0_45, %c0_46] : memref<1x32xf32, #tpu.memory_space<vmem>>, vector<1x32xf32>
    %96 = vector.broadcast %95 : vector<1x32xf32> to vector<8x32xf32>
    %97 = arith.addf %94, %96 : vector<8x32xf32>
    %c0_47 = arith.constant 0 : index
    %c0_48 = arith.constant 0 : index
    %c0_49 = arith.constant 0 : index
    %98 = vector.load %arg11[%c0_47, %c0_48, %c0_49] : memref<1x8x32xf32, #tpu.memory_space<vmem>>, vector<1x8x32xf32>
    %99 = vector.shape_cast %98 : vector<1x8x32xf32> to vector<8x32xf32>
    %100 = vector.shape_cast %97 : vector<8x32xf32> to vector<1x8x32xf32>
    tpu.vector_store %arg11[%c0_47, %c0_48, %c0_49], %100 {strides = array<i32>} : memref<1x8x32xf32, #tpu.memory_space<vmem>>, vector<1x8x32xf32>,
    return
  }
  func.func @transform_0(%arg0: i32, %arg1: i32) -> (i32, i32, i32) {
    %c0_i32 = arith.constant 0 : i32
    %c0_i32_0 = arith.constant 0 : i32
    return %arg0, %arg1, %c0_i32 : i32, i32, i32
  }
  func.func @transform_1(%arg0: i32, %arg1: i32) -> (i32, i32, i32) {
    %c0_i32 = arith.constant 0 : i32
    %c0_i32_0 = arith.constant 0 : i32
    %c0_i32_1 = arith.constant 0 : i32
    return %arg0, %c0_i32, %c0_i32_0 : i32, i32, i32
  }
  func.func @transform_2(%arg0: i32, %arg1: i32) -> (i32, i32, i32) {
    %c0_i32 = arith.constant 0 : i32
    %c0_i32_0 = arith.constant 0 : i32
    %c0_i32_1 = arith.constant 0 : i32
    return %arg0, %c0_i32, %c0_i32_0 : i32, i32, i32
  }
  func.func @transform_3(%arg0: i32, %arg1: i32) -> (i32, i32, i32) {
    %c0_i32 = arith.constant 0 : i32
    %c0_i32_0 = arith.constant 0 : i32
    return %arg0, %arg1, %c0_i32 : i32, i32, i32
  }
  func.func @transform_4(%arg0: i32, %arg1: i32) -> (i32, i32) {
    %c0_i32 = arith.constant 0 : i32
    %c0_i32_0 = arith.constant 0 : i32
    %c0_i32_1 = arith.constant 0 : i32
    return %c0_i32, %c0_i32_0 : i32, i32
  }
  func.func @transform_5(%arg0: i32, %arg1: i32) -> (i32, i32) {
    %c0_i32 = arith.constant 0 : i32
    %c0_i32_0 = arith.constant 0 : i32
    %c0_i32_1 = arith.constant 0 : i32
    return %c0_i32, %c0_i32_0 : i32, i32
  }
  func.func @transform_6(%arg0: i32, %arg1: i32) -> (i32, i32) {
    %c0_i32 = arith.constant 0 : i32
    %c0_i32_0 = arith.constant 0 : i32
    %c0_i32_1 = arith.constant 0 : i32
    return %c0_i32, %c0_i32_0 : i32, i32
  }
  func.func @transform_7(%arg0: i32, %arg1: i32) -> (i32, i32) {
    %c0_i32 = arith.constant 0 : i32
    %c0_i32_0 = arith.constant 0 : i32
    %c0_i32_1 = arith.constant 0 : i32
    return %c0_i32, %c0_i32_0 : i32, i32
  }
  func.func @transform_8(%arg0: i32, %arg1: i32) -> (i32, i32) {
    %c0_i32 = arith.constant 0 : i32
    %c0_i32_0 = arith.constant 0 : i32
    %c0_i32_1 = arith.constant 0 : i32
    return %c0_i32, %c0_i32_0 : i32, i32
  }
  func.func @transform_9(%arg0: i32, %arg1: i32) -> (i32, i32, i32) {
    %c0_i32 = arith.constant 0 : i32
    %c0_i32_0 = arith.constant 0 : i32
    return %arg0, %arg1, %c0_i32 : i32, i32, i32
  }
}

</mosaic_0001>

<bundles_post_ra>
// kernel: tpu_custom_call.1
= control target key start
LH: loop header
LB: loop body
LE: loop exit
PB: predicated region body
PF: predicated region fallthrough
CT: control target
= control target key end

     0   :  { %s3036_s0 = inlined_call_operand.hbm [shape: f32[2,8,32], index: 0, kind: input, shape index: {}]   ;;  %s3037_s1 = inlined_call_operand.hbm [shape: f32[2,8,32], index: 1, kind: input, shape index: {}]   ;;  %s3038_s2 = inlined_call_operand.hbm [shape: f32[2,8,32], index: 2, kind: input, shape index: {}]   ;;  %s3039_s3 = inlined_call_operand.hbm [shape: f32[2,8,8], index: 3, kind: input, shape index: {}]   ;;  %s3040_s4 = inlined_call_operand.hbm [shape: f32[32,32], index: 4, kind: input, shape index: {}]   ;;  %s3041_s5 = inlined_call_operand.hbm [shape: f32[32,32], index: 5, kind: input, shape index: {}]   ;;  %s3042_s6 = inlined_call_operand.hbm [shape: f32[32,32], index: 6, kind: input, shape index: {}]   ;;  %s3043_s7 = inlined_call_operand.hbm [shape: f32[32,32], index: 7, kind: input, shape index: {}]   ;;  %s3044_s8 = inlined_call_operand.vmem [shape: f32[1,32], index: 8, kind: input, shape index: {}]   ;;  %s3045_s9 = inlined_call_operand.hbm [shape: f32[2,8,32], index: 9, kind: output, shape index: {}]  }
   0x1   :  { %3061 = sst [smem:[#allocation29_spill]] %s3037_s1 }
   0x2   :  { %3062 = sst [smem:[#allocation30_spill]] %s3040_s4 }
   0x3   :  { %3063 = sst [smem:[#allocation31_spill]] %s3041_s5 }
   0x4   :  { %3064 = sst [smem:[#allocation32_spill]] %s3042_s6 }
   0x5   :  { %3065 = sst [smem:[#allocation33_spill]] %s3045_s9 }
   0x6   :  { %14 = vsyncpa [#allocation3], 0 }
   0x7   :  { %16 = vsyncpa [#allocation3 + $0x1], 0 }
   0x8   :  { %17 = vsyncpa [#allocation6], 0 }
   0x9   :  { %19 = vsyncpa [#allocation6 + $0x1], 0 }
   0xa   :  { %20 = vsyncpa [#allocation9], 0 }
   0xb   :  { %22 = vsyncpa [#allocation9 + $0x1], 0 }
   0xc   :  { %23 = vsyncpa [#allocation12], 0 }
   0xd   :  { %24 = vsyncpa [#allocation15], 0 }
   0xe   :  { %25 = vsyncpa [#allocation4], 0 }
   0xf   :  { %27 = vsyncpa [#allocation4 + $0x1], 0  ;;  %s2641_s30 = smov 0   ;;  %s2643_s10 = smov 0  }
  0x10   :  { %s2645_s11 = smov 0   ;;  %s2647_s12 = smov 0  }
  0x11   :  { %s2649_s13 = smov 0   ;;  %s2651_s14 = smov 0  }
  0x12 LB: > { %3066 = sst [smem:[#allocation24_spill]] %s2553_s30  ;;  %s2672_s15 = sadd.s32 4294967295, %s2573_s14   ;;  %s2573_s14 = sphi %s2651_s14, %s33_s14   ;;  %s2569_s13 = sphi %s2649_s13, %s3104_s13   ;;  %s2565_s12 = sphi %s2647_s12, %s3103_s12   ;;  %s2561_s11 = sphi %s2645_s11, %s3107_s11   ;;  %s2557_s10 = sphi %s2643_s10, %s3106_s10   ;;  %s2553_s30 = sphi %s2641_s30, %s3105_s30  }
  0x13   : > { %3067 = sst [smem:[#allocation25_spill]] %s2569_s13  ;;  %s1935_s16 = sadd.s32 4294967294, %s2573_s14  }
  0x14   : > { %p67_p0 = scmp.ne.s32.totalorder %s2557_s10, %s2553_s30  ;;  %p3046_p1 = scmp.eq.s32.totalorder %s2672_s15, 0 }
  0x15   : > { %p278_p2 = scmp.eq.s32.totalorder %s2672_s15, 1  ;;  %p284_p3 = scmp.eq.s32.totalorder %s1935_s16, 1 }
  0x16   : > { %p2681_p4 = por %p3046_p1, %p67_p0  ;;  %p1936_p5 = scmp.ge.s32.totalorder %s2573_s14, 1 }
  0x17   : > { %p2686_p6 = por %p284_p3, %p67_p0  ;;  %p291_p7 = scmp.lt.s32.totalorder %s2573_s14, 3 }
  0x18   : > { %s2575_s20 = smov [#allocation10]   ;;  %s2576_s23 = smov [#allocation11]  }
  0x19   : > { %s3069_s18 = scalar_select %p2686_p6, 1, 0 }
  0x1a   : > { %p2691_p8 = pnand %p1936_p5, %p291_p7  ;;  %s303_s21 = sshll.u32 %s2575_s20, 4  ;;  %s304_s21 = int_to_ptr.vmem [resolvable:$true] %s303_s21 }
  0x1b   : > { %3070 = sst [smem:[#allocation26_spill]] %s3069_s18  ;;  %s316_s24 = sshll.u32 %s2576_s23, 4  ;;  %s317_s24 = int_to_ptr.vmem [resolvable:$true] %s316_s24 }
  0x1c   : > { %p2142_p9 = pneg %p2691_p8  ;;  %s2268_s25 = scalar_lea.vmem %s304_s21, 512 }
  0x1d   : > { %p2269_p13 = scmp.ne.s32.totalorder %s304_s21, %s2268_s25  ;;  %p2276_p5 = scmp.lt.s32.totalorder %s304_s21, %s304_s21 }
  0x1e   : > { %p2700_p11 = pnand %p2142_p9, %p3046_p1  ;;  %p2277_p7 = scmp.lt.s32.totalorder %s2268_s25, %s2268_s25 }
  0x20   : > { %p3056_p12 = pneg %p2700_p11  ;;  %p2278_p10 = por %p2277_p7, %p2276_p5 }
  0x22   : > { %p2271_p0 = pnand %p2269_p13, %p3056_p12 }
  0x24   : > { %p2272_p3 = pneg %p2271_p0 }
  0x26   : > { %p2279_p9 = pnand %p2278_p10, %p2272_p3 }
  0x28   : > { %2282 = shalt.err (!%p2279_p9)
}
  0x29   : > { %s3047_s26 = smov 128   ;;  %s3049_s27 = smov 8  }
  0x2a   : > { %s3073_s4 = sld [smem:[#allocation30_spill]]  ;;  %s2294_s16 = scalar_lea.vmem %s317_s24, 512 }
  0x2b   : > { %p2295_p13 = scmp.ne.s32.totalorder %s317_s24, %s2294_s16  ;;  %p2302_p10 = scmp.lt.s32.totalorder %s317_s24, %s317_s24 }
  0x2c   : > { %p2303_p3 = scmp.lt.s32.totalorder %s2294_s16, %s2294_s16 }
  0x2d   : > { %p2297_p0 = pnand %p2295_p13, %p3056_p12 }
  0x2e   : > { %p2304_p7 = por %p2303_p3, %p2302_p10 }
  0x2f   : > { %p2298_p5 = pneg %p2297_p0 }
  0x30   : > { %2145 = dma.hbm_to_vmem [thread:$0]  (!%p2700_p11), %s3073_s4, 512, %s304_s21, [#allocation9], %s3047_s26, %s3047_s26, %s3049_s27  }
  0x31   : > { %p2305_p9 = pnand %p2304_p7, %p2298_p5 }
  0x33   : > { %2308 = shalt.err (!%p2305_p9)
}
  0x34   : > { %s3074_s5 = sld [smem:[#allocation31_spill]]  ;;  %s45_s21 = sadd.s32 1, %s2569_s13 }
  0x35   : > { %s54_s25 = sadd.s32 1, %s2561_s11  ;;  %p47_p13 = scmp.ge.s32.totalorder %s45_s21, 2 }
  0x36   : > { %p61_p0 = scmp.ne.s32.totalorder %s2561_s11, %s2557_s10  ;;  %p62_p5 = scmp.eq.s32.totalorder %s2573_s14, 0 }
  0x37   : > { %p2176_p10 = scmp.lt.s32.totalorder %s2573_s14, 2  ;;  %s3109_s21 = smov (%p47_p13, %s45_s21), 0 }
  0x38   : > { %3075 = sst [smem:[#allocation27_spill]] %s3109_s21  ;;  %p63_p3 = por %p62_p5, %p61_p0 }
  0x39   : > { %p2738_p7 = por %p278_p2, %p61_p0  ;;  %s49_s29 = ssub.s32 %s2569_s13, %s3109_s21 }
  0x3a   : > { %2148 = dma.hbm_to_vmem [thread:$0]  (!%p2700_p11), %s3074_s5, 512, %s317_s24, [#allocation12], %s3047_s26, %s3047_s26, %s3049_s27  }
  0x3b   : > { %s3076_s28 = scalar_select %p2738_p7, 1, 0 }
  0x3c   : > { %s3052_s24 = sand.u32 1, %s2561_s11   ;;  %p52_p9 = scmp.eq.s32.totalorder %s49_s29, 0 }
  0x3d   : > { %s2747_s16 = sshll.u32 %s3052_s24, 3  ;;  %s2750_s20 = sshll.u32 %s2569_s13, 7 }
  0x3e   : > { %p2752_p1 = pnand %p2176_p10, %p63_p3  ;;  %s3057_s27 = sand.u32 1, %s2573_s14  }
  0x3f   : > { %s2757_s26 = scalar_select %p52_p9, %s2561_s11, %s54_s25  }
  0x40   : > { %s3079_s1 = sld [smem:[#allocation29_spill]]  ;;  %s382_s21 = scalar_lea.vmem [#allocation5], %s2747_s16 }
  0x41   : > { %3078 = sst [smem:[#allocation28_spill]] %s2757_s26  ;;  %s389_s24 = sshll.u32 %s382_s21, 4  ;;  %s390_s24 = int_to_ptr.vmem [resolvable:$true] %s389_s24 }
  0x42   : > { %s2767_s13 = scalar_lea.sflag [#allocation6], %s3057_s27  ;;  %p3058_p2 = pneg %p2752_p1 }
  0x43   : > { %s2322_s18 = scalar_lea.vmem %s390_s24, 128  ;;  %s2579_s25 = smov [#allocation5]  }
  0x44   : > { %p2323_p13 = scmp.ne.s32.totalorder %s390_s24, %s2322_s18  ;;  %s2327_s26 = sshll.u32 %s2579_s25, 4  ;;  %s2328_s26 = int_to_ptr.vmem [resolvable:$false] %s2327_s26 }
  0x45   : > { %s2329_s30 = scalar_lea.vmem %s2328_s26, 256  ;;  %p2330_p10 = scmp.lt.s32.totalorder %s390_s24, %s2328_s26 }
  0x46   : > { %s387_s29 = scalar_lea.hbm %s3079_s1, %s2750_s20  ;;  %p2325_p0 = pnand %p2323_p13, %p3058_p2 }
  0x47   : > { %p2331_p3 = scmp.lt.s32.totalorder %s2329_s30, %s2322_s18 }
  0x48   : > { %p2326_p5 = pneg %p2325_p0 }
  0x49   : > { %p2332_p9 = por %p2331_p3, %p2330_p10 }
  0x4b   : > { %p2333_p12 = pnand %p2332_p9, %p2326_p5 }
  0x4d   : > { %2336 = shalt.err (!%p2333_p12)
}
  0x4e   : > { %2161 = dma.hbm_to_vmem [thread:$0]  (!%p2752_p1), %s387_s29, 128, %s390_s24, %s2767_s13  }
  0x4f   : > { %s2580_s4 = smov [#allocation13]   ;;  %s2581_s21 = smov [#allocation14]  }
  0x50   : > { %s329_s5 = sshll.u32 %s2580_s4, 4  ;;  %s342_s27 = sshll.u32 %s2581_s21, 4  ;;  %s330_s5 = int_to_ptr.vmem [resolvable:$true] %s329_s5  ;;  %s343_s27 = int_to_ptr.vmem [resolvable:$true] %s342_s27 }
  0x51   : > { %s2348_s1 = scalar_lea.vmem %s330_s5, 512  ;;  %p3080_p0 = pneg %p2700_p11 }
  0x52   : > { %p2349_p13 = scmp.ne.s32.totalorder %s330_s5, %s2348_s1  ;;  %p2356_p10 = scmp.lt.s32.totalorder %s330_s5, %s330_s5 }
  0x53   : > { %p2357_p5 = scmp.lt.s32.totalorder %s2348_s1, %s2348_s1 }
  0x54   : > { %p2351_p2 = pnand %p2349_p13, %p3080_p0 }
  0x55   : > { %p2358_p12 = por %p2357_p5, %p2356_p10 }
  0x56   : > { %p2352_p6 = pneg %p2351_p2 }
  0x58   : > { %p2359_p3 = pnand %p2358_p12, %p2352_p6 }
  0x5a   : > { %2362 = shalt.err (!%p2359_p3)
}
  0x5b   : > { %s3081_s30 = smov 8   ;;  %s3082_s18 = smov 128  }
  0x5c   : > { %s3083_s6 = sld [smem:[#allocation32_spill]]  ;;  %s2374_s29 = scalar_lea.vmem %s343_s27, 512 }
  0x5d   : > { %p2375_p9 = scmp.ne.s32.totalorder %s343_s27, %s2374_s29  ;;  %p3084_p13 = pmov %p3080_p0 }
  0x5e   : > { %p2382_p7 = scmp.lt.s32.totalorder %s343_s27, %s343_s27  ;;  %p2383_p10 = scmp.lt.s32.totalorder %s2374_s29, %s2374_s29 }
  0x5f   : > { %p2377_p2 = pnand %p2375_p9, %p3084_p13 }
  0x60   : > { %p2384_p6 = por %p2383_p10, %p2382_p7 }
  0x61   : > { %p2378_p0 = pneg %p2377_p2 }
  0x62   : > { %2151 = dma.hbm_to_vmem [thread:$0]  (!%p2700_p11), %s3083_s6, 512, %s330_s5, [#allocation12], %s3082_s18, %s3082_s18, %s3081_s30  }
  0x63   : > { %p2385_p5 = pnand %p2384_p6, %p2378_p0 }
  0x65   : > { %2388 = shalt.err (!%p2385_p5)
}
  0x66   : > { %2154 = dma.hbm_to_vmem [thread:$0]  (!%p2700_p11), %s3043_s7, 512, %s343_s27, [#allocation15], %s3082_s18, %s3082_s18, %s3081_s30  }
  0x67   : > { %s369_s21 = scalar_lea.hbm %s3036_s0, %s2750_s20  ;;  %s363_s26 = scalar_lea.vmem [#allocation2], %s2747_s16 }
  0x68   : > { %s371_s24 = sshll.u32 %s363_s26, 4  ;;  %s3085_s29 = sand.u32 1, %s2561_s11   ;;  %s372_s24 = int_to_ptr.vmem [resolvable:$true] %s371_s24 }
  0x69   : > { %s360_s22 = scalar_lea.sflag [#allocation3], %s3085_s29  ;;  %s2402_s6 = scalar_lea.vmem %s372_s24, 128 }
  0x6a   : > { %p2403_p7 = scmp.ne.s32.totalorder %s372_s24, %s2402_s6  ;;  %p3086_p12 = pneg %p2752_p1 }
  0x6b   : > { %s2582_s1 = smov [#allocation2]  }
  0x6c   : > { %p2405_p3 = pnand %p2403_p7, %p3086_p12  ;;  %s2407_s25 = sshll.u32 %s2582_s1, 4  ;;  %s2408_s25 = int_to_ptr.vmem [resolvable:$false] %s2407_s25 }
  0x6d   : > { %s2409_s9 = scalar_lea.vmem %s2408_s25, 256  ;;  %p2410_p11 = scmp.lt.s32.totalorder %s372_s24, %s2408_s25 }
  0x6e   : > { %p2406_p9 = pneg %p2405_p3  ;;  %p2411_p13 = scmp.lt.s32.totalorder %s2409_s9, %s2402_s6 }
  0x70   : > { %p2412_p2 = por %p2411_p13, %p2410_p11 }
  0x72   : > { %p2413_p0 = pnand %p2412_p2, %p2406_p9 }
  0x74   : > { %2416 = shalt.err (!%p2413_p0)
}
  0x75   : > { %2158 = dma.hbm_to_vmem [thread:$0]  (!%p2752_p1), %s369_s21, 128, %s372_s24, %s360_s22  }
  0x76   : > { %s405_s18 = scalar_lea.hbm %s3038_s2, %s2750_s20  ;;  %s400_s4 = scalar_lea.vmem [#allocation7], %s2747_s16 }
  0x77   : > { %s407_s5 = sshll.u32 %s400_s4, 4  ;;  %p3087_p6 = pmov %p3086_p12  ;;  %s408_s5 = int_to_ptr.vmem [resolvable:$true] %s407_s5 }
  0x78   : > { %s2430_s26 = scalar_lea.vmem %s408_s5, 128  ;;  %s2583_s6 = smov [#allocation7]  }
  0x79   : > { %p2431_p10 = scmp.ne.s32.totalorder %s408_s5, %s2430_s26  ;;  %s2435_s9 = sshll.u32 %s2583_s6, 4  ;;  %s2436_s9 = int_to_ptr.vmem [resolvable:$false] %s2435_s9 }
  0x7a   : > { %s2437_s29 = scalar_lea.vmem %s2436_s9, 256  ;;  %p2438_p12 = scmp.lt.s32.totalorder %s408_s5, %s2436_s9 }
  0x7b   : > { %p2433_p5 = pnand %p2431_p10, %p3087_p6  ;;  %p2439_p3 = scmp.lt.s32.totalorder %s2437_s29, %s2430_s26 }
  0x7d   : > { %p2434_p7 = pneg %p2433_p5  ;;  %p2440_p9 = por %p2439_p3, %p2438_p12 }
  0x7f   : > { %p2441_p11 = pnand %p2440_p9, %p2434_p7 }
  0x81   : > { %2444 = shalt.err (!%p2441_p11)
}
  0x82   : > { %2164 = dma.hbm_to_vmem [thread:$0]  (!%p2752_p1), %s405_s18, 128, %s408_s5, %s2767_s13  }
  0x83   : > { %s424_s22 = scalar_lea.hbm %s3039_s3, %s2750_s20  ;;  %s418_s1 = scalar_lea.vmem [#allocation8], %s2747_s16 }
  0x84   : > { %s426_s25 = sshll.u32 %s418_s1, 4  ;;  %s3088_s27 = sand.u32 1, %s2573_s14   ;;  %s427_s25 = int_to_ptr.vmem [resolvable:$true] %s426_s25 }
  0x85   : > { %s415_s30 = scalar_lea.sflag [#allocation9], %s3088_s27  ;;  %s2458_s4 = scalar_lea.vmem %s427_s25, 128 }
  0x86   : > { %p2459_p13 = scmp.ne.s32.totalorder %s427_s25, %s2458_s4  ;;  %p3089_p2 = pmov %p3087_p6 }
  0x87   : > { %s2584_s26 = smov [#allocation8]  }
  0x88   : > { %p2461_p0 = pnand %p2459_p13, %p3089_p2  ;;  %s2463_s6 = sshll.u32 %s2584_s26, 4  ;;  %s2464_s6 = int_to_ptr.vmem [resolvable:$false] %s2463_s6 }
  0x89   : > { %s2465_s9 = scalar_lea.vmem %s2464_s6, 256  ;;  %p2466_p6 = scmp.lt.s32.totalorder %s427_s25, %s2464_s6 }
  0x8a   : > { %p2462_p10 = pneg %p2461_p0  ;;  %p2467_p5 = scmp.lt.s32.totalorder %s2465_s9, %s2458_s4 }
  0x8c   : > { %p2468_p7 = por %p2467_p5, %p2466_p6 }
  0x8e   : > { %p2469_p12 = pnand %p2468_p7, %p2462_p10 }
  0x90   : > { %2472 = shalt.err (!%p2469_p12)
}
  0x91   : > { %2167 = dma.hbm_to_vmem [thread:$0]  (!%p2752_p1), %s424_s22, 128, %s427_s25, %s415_s30  }
  0x92   : > { %435 = sbr.rel (%p2691_p8) target bundleno = 2614 (0xa36), region = 56  ;;  %s2837_s13 = sand.u32 (!%p2691_p8), 1, %s2557_s10  }
  0x93   : > { %s2840_s16 = sshll.u32 (!%p2691_p8), %s2837_s13, 3  ;;  %s438_s20 = scalar_lea.sflag (!%p2691_p8), [#allocation3], %s2837_s13 }
  0x94   : > { %s441_s18 = scalar_lea.vmem (!%p2691_p8), [#allocation2], %s2840_s16 }
  0x97   : > { %2524 = dma.done.wait (%p2681_p4), %s438_s20, 128  }
  0x98   : > { %2526 = vsyncadd (%p2681_p4), %s438_s20, 4294967168  ;;  %s446_s19 = sand.u32 1, %s2672_s15   ;;  %s450_s5 = scalar_lea.vmem [#allocation5], %s2840_s16 }
  0x99   : > { %s447_s23 = scalar_lea.sflag [#allocation6], %s446_s19 }
  0x9a   : > { %2528 = dma.done.wait (%p2681_p4), %s447_s23, 256  }
  0x9b   : > { %2530 = vsyncadd (%p2681_p4), %s447_s23, 4294967040  ;;  %s459_s29 = scalar_lea.vmem [#allocation7], %s2840_s16  ;;  %s465_s21 = scalar_lea.sflag [#allocation9], %s446_s19 }
  0x9c   : > { %s468_s24 = scalar_lea.vmem [#allocation8], %s2840_s16 }
  0x9d   : > { %2532 = dma.done.wait (%p2681_p4), %s465_s21, 128  }
  0x9e   : > { %2534 = vsyncadd (%p2681_p4), %s465_s21, 4294967168  ;;  %p3090_p1 = scmp.eq.s32.totalorder %s2672_s15, 0 }
  0xa0   : > { %2536 = dma.done.wait (%p3090_p1), [#allocation9], 512   ;;  %p3091_p8 = pmov %p3090_p1 }
  0xa1   : > { %p3092_p3 = pmov %p3090_p1 }
  0xa2   : > { %2538 = vsyncadd (%p3091_p8), [#allocation9], 4294966784 }
  0xa3   : > { %2540 = dma.done.wait (%p3092_p3), [#allocation12], 1024   ;;  %p3093_p9 = pmov %p3090_p1 }
  0xa4   : > { %p3094_p11 = pmov %p3090_p1 }
  0xa5   : > { %2542 = vsyncadd (%p3093_p9), [#allocation12], 4294966272 }
  0xa6   : > { %2544 = dma.done.wait (%p3094_p11), [#allocation15], 512   ;;  %p3095_p13 = pmov %p3090_p1 }
  0xa7   : > { %v2585_v0 = vmov 0.0   ;;  %vm2586_vm0 = vmmov 0   ;;  %v619_v1 = vld [vmem:[#allocation11 + $0x18] sm:$0xff]  ;;  %v618_v3 = vld [vmem:[#allocation11 + $0x10] sm:$0xff]  ;;  %v617_v5 = vld [vmem:[#allocation11 + $0x8] sm:$0xff]  ;;  %vm542_vm1 = vcmask 261120  }
  0xa8   : > { %2546 = vsyncadd (%p3095_p13), [#allocation15], 4294966784  ;;  %2034 = vmatprep.subr.mxu1 %v2585_v0  ;;  %2023 = vmatprep.subr.mxu0 %v2585_v0  ;;  %v541_v2 = vld [vmem:[#allocation10 + $0x18] sm:$0xff]  ;;  %v540_v4 = vld [vmem:[#allocation10 + $0x10] sm:$0xff]  ;;  %vm770_vm2 = vcmask 64512   ;;  %s2587_s15 = smov 120  }
  0xa9   : > { %2042 = vmatprep.mubr.msk.f32.mxu1 %vm2586_vm0, %v2585_v0  ;;  %2031 = vmatprep.mubr.msk.f32.mxu0 %vm2586_vm0, %v2585_v0  ;;  %v539_v6 = vld [vmem:[#allocation10 + $0x8] sm:$0xff]  ;;  %v616_v7 = vld [vmem:[#allocation11] sm:$0xff]  ;;  %v535_v9 = vld [vmem:[%s450_s5] sm:$0xff]  ;;  %s2588_s17 = smov 112   ;;  %s2589_s22 = smov 104  }
  0xaa   : > { %2035 = vmatpush3.msra.mxu1 %v619_v1  ;;  %2024 = vmatpush3.msra.mxu0 %v541_v2  ;;  %v538_v8 = vld [vmem:[#allocation10] sm:$0xff]  ;;  %v696_v11 = vld [vmem:[#allocation13 + $0x18] sm:$0xff]  ;;  %v695_v12 = vld [vmem:[#allocation13 + $0x10] sm:$0xff]  ;;  %s1981_s27 = sshll.u32 %s2565_s12, 7  ;;  %s533_s30 = scalar_lea.vmem [#allocation16], %s2840_s16 }
  0xab   : > { %2036 = vmatprep.subr.mxu1 %v2585_v0  ;;  %2025 = vmatprep.subr.mxu0 %v2585_v0  ;;  %v534_v10 = vld [vmem:[%s441_s18] sm:$0xff]  ;;  %v2931_v24 = vld [vmem:[%s468_s24] sm:$0xff]  ;;  %s1749_s4 = sshll.u32 %s533_s30, 4  ;;  %s3096_s9 = sld [smem:[#allocation33_spill]]  ;;  %s1750_s4 = int_to_ptr.vmem [resolvable:$true] %s1749_s4 }
  0xac   : > { %2037 = vmatpush3.msra.mxu1 %v618_v3  ;;  %2026 = vmatpush3.msra.mxu0 %v540_v4  ;;  %v694_v13 = vld [vmem:[#allocation13 + $0x8] sm:$0xff]  ;;  %v693_v14 = vld [vmem:[#allocation13] sm:$0xff]  ;;  %s1735_s18 = scalar_lea.sflag [#allocation4], %s2837_s13  ;;  %s2473_s19 = scalar_lea.vmem %s1750_s4, 128 }
  0xad   : > { %2038 = vmatprep.subr.mxu1 %v2585_v0  ;;  %2027 = vmatprep.subr.mxu0 %v2585_v0  ;;  %v536_v15 = vld [vmem:[%s459_s29] sm:$0xff]  ;;  %p2474_p4 = scmp.ne.s32.totalorder %s1750_s4, %s2473_s19  ;;  %p3097_p2 = scmp.ne.s32.totalorder %s3076_s28, 0 }
  0xae   : > { %2039 = vmatpush3.msra.mxu1 %v617_v5  ;;  %2028 = vmatpush3.msra.mxu0 %v539_v6  ;;  %v1098_v46 = vld [vmem:[#allocation14 + $0x8] sm:$0xff]  ;;  %v931_v51 = vld [vmem:[#allocation14] sm:$0xff]  ;;  %s2590_s23 = smov [#allocation16]  }
  0xaf   : > { %2040 = vmatprep.subr.mxu1 %v2585_v0  ;;  %2029 = vmatprep.subr.mxu0 %v2585_v0  ;;  %p2475_p0 = pnand %p2474_p4, %p3097_p2  ;;  %s2477_s12 = sshll.u32 %s2590_s23, 4  ;;  %s2478_s12 = int_to_ptr.vmem [resolvable:$false] %s2477_s12 }
  0xb0   : > { %2041 = vmatpush3.msra.mxu1 %v616_v7  ;;  %2030 = vmatpush3.msra.mxu0 %v538_v8  ;;  %s2479_s16 = scalar_lea.vmem %s2478_s12, 256  ;;  %p2480_p6 = scmp.lt.s32.totalorder %s1750_s4, %s2478_s12 }
  0xb1   : > { %2043 = vmatmul.mubr.msk.f32.vlgmr.msra.gmra.mxu1 %vm542_vm1, %v535_v9  ;;  %2032 = vmatmul.mubr.msk.f32.vlgmr.msra.gmra.mxu0 %vm542_vm1, %v534_v10  ;;  %s1747_s20 = scalar_lea.hbm %s3096_s9, %s1981_s27  ;;  %p2476_p10 = pneg %p2475_p0 }
  0xb2   : > { %2056 = vmatprep.subr.mxu1 %v2585_v0  ;;  %2058 = vmatprep.mubr.msk.f32.mxu1 %vm2586_vm0, %v2585_v0  ;;  %p2481_p5 = scmp.lt.s32.totalorder %s2479_s16, %s2473_s19 }
  0xb3   : > { %2045 = vmatprep.subr.mxu0 %v2585_v0  ;;  %2053 = vmatprep.mubr.msk.f32.mxu0 %vm2586_vm0, %v2585_v0 }
  0xb4   : > { %2046 = vmatpush3.msra.mxu0 %v696_v11  ;;  %p2482_p7 = por %p2481_p5, %p2480_p6 }
  0xb5   : > { %2047 = vmatprep.subr.mxu0 %v2585_v0 }
  0xb6   : > { %2048 = vmatpush3.msra.mxu0 %v695_v12  ;;  %p2483_p12 = pnand %p2482_p7, %p2476_p10 }
  0xb7   : > { %2049 = vmatprep.subr.mxu0 %v2585_v0 }
  0xb8   : > { %2050 = vmatpush3.msra.mxu0 %v694_v13 }
  0xb9   : > { %2051 = vmatprep.subr.mxu0 %v2585_v0 }
  0xba   : > { %2052 = vmatpush3.msra.mxu0 %v693_v14  ;;  %v1410_v14 = vld [vmem:[#allocation14 + $0x10] sm:$0xff] }
  0xbb   : > { %2054 = vmatmul.mubr.msk.f32.vlgmr.msra.gmra.mxu0 %vm542_vm1, %v536_v15  ;;  %2066 = vmatprep.subr.mxu0 %v2585_v0 }
  0xbc   : > { %2068 = vmatprep.mubr.msk.f32.mxu0 %vm2586_vm0, %v2585_v0 }
 0x171   : > { %v2905_v16 = vpop.f32.mrf.mxu1  ;;  %v2907_v17 = vpop.f32.mrf.mxu0 }
 0x172   : > { %934 = vrot.lane.b32.xlu0 %v2905_v16, %s2587_s15  ;;  %2057 = vmatpush3.xpose.msk.msra.mxu1 %vm770_vm2, %v2905_v16 }
 0x173   : > { %v2044_v18 = vpop.f32.mrf.mxu1  ;;  %v2033_v19 = vpop.f32.mrf.mxu0  ;;  %2061 = vmatprep.subr.mxu1 %v2585_v0 }
 0x175   : > { %2059 = vmatmul.mubr.msk.f32.vlgmr.msra.gmra.mxu1 %vm770_vm2, %v2907_v17 }
 0x176   : > { %932 = vrot.lane.b32.xlu0 %v2907_v17, %s2587_s15  ;;  %2063 = vmatprep.mubr.msk.f32.mxu1 %vm2586_vm0, %v2585_v0 }
 0x17b   : > { %v2920_v20 = vpop.f32.mrf.mxu0 }
 0x17c   : > { %2062 = vmatpush3.msra.mxu1 %v2920_v20 }
 0x17d   : > { %v2055_v21 = vpop.f32.mrf.mxu0  ;;  %2071 = vmatprep.subr.mxu1 %v2585_v0 }
 0x1e4   : > { %v935_v22 = vpop.permute.xlu0 %934 }
 0x1e5   : > { %2067 = vmatpush3.xpose.msk.msra.mxu0 %vm770_vm2, %v935_v22 }
 0x1e6   : > { %2076 = vmatprep.subr.mxu0 %v2585_v0 }
 0x1e8   : > { %v933_v23 = vpop.permute.xlu0 %932 }
 0x1e9   : > { %2069 = vmatmul.mubr.msk.f32.vlgmr.msra.gmra.mxu0 %vm770_vm2, %v933_v23 }
 0x1ea   : > { %2078 = vmatprep.mubr.msk.f32.mxu0 %vm2586_vm0, %v2585_v0  ;;  %2077 = vmatpush3.msra.mxu0 %v1098_v46 }
 0x1eb   : > { %2086 = vmatprep.subr.mxu0 %v2585_v0 }
 0x235   : > { %v843_v25 = vpop.f32.mrf.mxu1 }
 0x236   : > { %v844_v26 = vadd.f32 %v843_v25, %v2931_v24 }
 0x237   : > { %v2060_v27 = vpop.f32.mrf.mxu1 }
 0x238   : > { %v847_v28 = vsel %vm770_vm2, %v844_v26, -inf }
 0x239   : > { %848 = vmax.xlane.f32.xlu1 %v847_v28  ;;  %v1650_v28 = vld [vmem:[#allocation14 + $0x18] sm:$0xff] }
 0x2a9   : > { %v1006_v29 = vpop.f32.mrf.mxu0 }
 0x2aa   : > { %v1007_v30 = vadd.f32 %v1006_v29, %v2931_v24 }
 0x2ab   : > { %v2070_v31 = vpop.f32.mrf.mxu0 }
 0x2ac   : > { %v1010_v32 = vsel %vm770_vm2, %v1007_v30, -inf }
 0x2ad   : > { %1011 = vmax.xlane.f32.xlu1 %v1010_v32 }
 0x2c2   : > { %v849_v33 = vpop.xlane.xlu1 %848 }
 0x2c3   : > { %v850_v34 = vsub.f32 %v844_v26, %v849_v33 }
 0x2c5   : > { %v851_v35 = vmul.f32 1.442695, %v850_v34 }
 0x2c7   : > { %2241 = vpow2.f32 %v851_v35 }
 0x2d4   : > { %v2242_v36 = vpop.eup %2241 }
 0x2d5   : > { %v853_v37 = vsel %vm770_vm2, %v2242_v36, 0.0 }
 0x2d6   : > { %854 = vadd.xlane.f32.xlu0 %v853_v37  ;;  %v1979_v37 = vld [vmem:[%s3044_s8] ss:$0 sm:$0xff] }
 0x2ec   : > { %1334 = vrot.lane.b32.xlu0 %v2920_v20, %s2588_s17 }
 0x336   : > { %v1012_v38 = vpop.xlane.xlu1 %1011 }
 0x337   : > { %v1013_v39 = vsub.f32 %v1007_v30, %v1012_v38 }
 0x339   : > { %v1014_v40 = vmul.f32 1.442695, %v1013_v39 }
 0x33b   : > { %2243 = vpow2.f32 %v1014_v40 }
 0x348   : > { %v2244_v41 = vpop.eup %2243 }
 0x349   : > { %v1016_v42 = vsel %vm770_vm2, %v2244_v41, 0.0 }
 0x34a   : > { %1017 = vadd.xlane.f32.xlu1 %v1016_v42 }
 0x35b   : > { %1022 = vrot.lane.b32.xlu1 %v2920_v20, %s2587_s15 }
 0x35f   : > { %v855_v43 = vpop.xlane.xlu0 %854  ;;  %1247 = vrot.lane.b32.xlu1 %v2905_v16, %s2588_s17 }
 0x360   : > { %2245 = vrcp.f32 %v855_v43 }
 0x363   : > { %1245 = vrot.lane.b32.xlu1 %v2907_v17, %s2588_s17  ;;  %v1335_v53 = vpop.permute.xlu0 %1334 }
 0x36d   : > { %v2246_v44 = vpop.eup %2245 }
 0x36e   : > { %v857_v45 = vmul.f32 %v2246_v44, %v2242_v36 }
 0x370   : > { %2064 = vmatmul.mubr.msk.f32.vlgmr.msra.gmra.mxu1 %vm770_vm2, %v857_v45 }
 0x371   : > { %2073 = vmatprep.mubr.msk.f32.mxu1 %vm2586_vm0, %v2585_v0 }
 0x3d3   : > { %v1018_v47 = vpop.xlane.xlu1 %1017 }
 0x3d4   : > { %2247 = vrcp.f32 %v1018_v47 }
 0x3d7   : > { %v1023_v48 = vpop.permute.xlu1 %1022 }
 0x3d8   : > { %2072 = vmatpush3.msra.mxu1 %v1023_v48 }
 0x3d9   : > { %2081 = vmatprep.subr.mxu1 %v2585_v0 }
 0x3db   : > { %v1248_v55 = vpop.permute.xlu1 %1247 }
 0x3df   : > { %v1246_v58 = vpop.permute.xlu1 %1245 }
 0x3e1   : > { %v2248_v49 = vpop.eup %2247 }
 0x3e2   : > { %v1020_v50 = vmul.f32 %v2248_v49, %v2244_v41 }
 0x3e4   : > { %2074 = vmatmul.mubr.msk.f32.vlgmr.msra.gmra.mxu1 %vm770_vm2, %v1020_v50 }
 0x3e5   : > { %2082 = vmatpush3.msra.mxu1 %v931_v51  ;;  %2083 = vmatprep.mubr.msk.f32.mxu1 %vm2586_vm0, %v2585_v0 }
 0x3e6   : > { %2091 = vmatprep.subr.mxu1 %v2585_v0 }
 0x430   : > { %v927_v52 = vpop.f32.mrf.mxu1 }
 0x431   : > { %2084 = vmatmul.mubr.msk.f32.vlgmr.msra.gmra.mxu1 %vm770_vm2, %v927_v52 }
 0x432   : > { %2092 = vmatpush3.msra.mxu1 %v1335_v53  ;;  %v2065_v54 = vpop.f32.mrf.mxu1  ;;  %2093 = vmatprep.mubr.msk.f32.mxu1 %vm2586_vm0, %v2585_v0 }
 0x433   : > { %2101 = vmatprep.subr.mxu1 %v2585_v0 }
 0x4a4   : > { %v1094_v56 = vpop.f32.mrf.mxu1 }
 0x4a5   : > { %2079 = vmatmul.mubr.msk.f32.vlgmr.msra.gmra.mxu0 %vm770_vm2, %v1094_v56 }
 0x4a6   : > { %2087 = vmatpush3.xpose.msk.msra.mxu0 %vm770_vm2, %v1248_v55  ;;  %v2075_v57 = vpop.f32.mrf.mxu1  ;;  %2088 = vmatprep.mubr.msk.f32.mxu0 %vm2586_vm0, %v2585_v0 }
 0x4a7   : > { %2096 = vmatprep.subr.mxu0 %v2585_v0 }
 0x4a9   : > { %2089 = vmatmul.mubr.msk.f32.vlgmr.msra.gmra.mxu0 %vm770_vm2, %v1246_v58 }
 0x4aa   : > { %2098 = vmatprep.mubr.msk.f32.mxu0 %vm2586_vm0, %v2585_v0  ;;  %2097 = vmatpush3.msra.mxu0 %v1410_v14 }
 0x4ab   : > { %2106 = vmatprep.subr.mxu0 %v2585_v0 }
 0x4f1   : > { %v1241_v59 = vpop.f32.mrf.mxu1 }
 0x4f3   : > { %v2085_v60 = vpop.f32.mrf.mxu1 }
 0x565   : > { %v1168_v61 = vpop.f32.mrf.mxu0 }
 0x567   : > { %v2080_v62 = vpop.f32.mrf.mxu0 }
 0x569   : > { %v1319_v63 = vpop.f32.mrf.mxu0 }
 0x56a   : > { %v1320_v1 = vadd.f32 %v1319_v63, %v2931_v24 }
 0x56b   : > { %v2090_v2 = vpop.f32.mrf.mxu0 }
 0x56c   : > { %v1323_v3 = vsel %vm770_vm2, %v1320_v1, -inf }
 0x56d   : > { %1324 = vmax.xlane.f32.xlu1 %v1323_v3 }
 0x5f6   : > { %v1325_v4 = vpop.xlane.xlu1 %1324 }
 0x5f7   : > { %v1326_v5 = vsub.f32 %v1320_v1, %v1325_v4 }
 0x5f9   : > { %v1327_v6 = vmul.f32 1.442695, %v1326_v5 }
 0x5fb   : > { %2249 = vpow2.f32 %v1327_v6 }
 0x608   : > { %v2250_v7 = vpop.eup %2249 }
 0x609   : > { %v1329_v8 = vsel %vm770_vm2, %v2250_v7, 0.0 }
 0x60a   : > { %1330 = vadd.xlane.f32.xlu0 %v1329_v8 }
 0x620   : > { %1487 = vrot.lane.b32.xlu0 %v2905_v16, %s2589_s22 }
 0x624   : > { %1485 = vrot.lane.b32.xlu0 %v2907_v17, %s2589_s22 }
 0x693   : > { %v1331_v9 = vpop.xlane.xlu0 %1330 }
 0x694   : > { %2251 = vrcp.f32 %v1331_v9 }
 0x697   : > { %v1488_v11 = vpop.permute.xlu0 %1487 }
 0x69b   : > { %v1486_v13 = vpop.permute.xlu0 %1485 }
 0x6a1   : > { %v2252_v10 = vpop.eup %2251 }
 0x6a2   : > { %v1333_v12 = vmul.f32 %v2252_v10, %v2250_v7 }
 0x6a4   : > { %2094 = vmatmul.mubr.msk.f32.vlgmr.msra.gmra.mxu1 %vm770_vm2, %v1333_v12 }
 0x6a5   : > { %2102 = vmatpush3.xpose.msk.msra.mxu1 %vm770_vm2, %v1488_v11  ;;  %2103 = vmatprep.mubr.msk.f32.mxu1 %vm2586_vm0, %v2585_v0 }
 0x6a6   : > { %2111 = vmatprep.subr.mxu1 %v2585_v0 }
 0x6a8   : > { %2104 = vmatmul.mubr.msk.f32.vlgmr.msra.gmra.mxu1 %vm770_vm2, %v1486_v13 }
 0x6a9   : > { %2113 = vmatprep.mubr.msk.f32.mxu1 %vm2586_vm0, %v2585_v0  ;;  %2112 = vmatpush3.msra.mxu1 %v1650_v28 }
 0x764   : > { %v1406_v15 = vpop.f32.mrf.mxu1 }
 0x765   : > { %2099 = vmatmul.mubr.msk.f32.vlgmr.msra.gmra.mxu0 %vm770_vm2, %v1406_v15 }
 0x766   : > { %v2095_v16 = vpop.f32.mrf.mxu1  ;;  %2108 = vmatprep.mubr.msk.f32.mxu0 %vm2586_vm0, %v2585_v0  ;;  %v1242_v0 = vadd.f32 %v1241_v59, %v1168_v61 }
 0x768   : > { %v1559_v17 = vpop.f32.mrf.mxu1 }
 0x769   : > { %v1560_v18 = vadd.f32 %v1559_v17, %v2931_v24 }
 0x76a   : > { %v2105_v19 = vpop.f32.mrf.mxu1 }
 0x76b   : > { %v1563_v21 = vsel %vm770_vm2, %v1560_v18, -inf }
 0x76c   : > { %1564 = vmax.xlane.f32.xlu0 %v1563_v21 }
 0x7f5   : > { %v1565_v22 = vpop.xlane.xlu0 %1564 }
 0x7f6   : > { %v1566_v23 = vsub.f32 %v1560_v18, %v1565_v22 }
 0x7f8   : > { %v1567_v25 = vmul.f32 1.442695, %v1566_v23 }
 0x7fa   : > { %2253 = vpow2.f32 %v1567_v25 }
 0x807   : > { %v2254_v26 = vpop.eup %2253 }
 0x808   : > { %v1569_v27 = vsel %vm770_vm2, %v2254_v26, 0.0 }
 0x809   : > { %1570 = vadd.xlane.f32.xlu1 %v1569_v27 }
 0x81a   : > { %1574 = vrot.lane.b32.xlu1 %v2920_v20, %s2589_s22 }
 0x825   : > { %v1480_v24 = vpop.f32.mrf.mxu0 }
 0x826   : > { %v1484_v29 = vadd.f32 %v1480_v24, %v1242_v0 }
 0x827   : > { %v2100_v30 = vpop.f32.mrf.mxu0 }
 0x892   : > { %v1571_v31 = vpop.xlane.xlu1 %1570 }
 0x893   : > { %2255 = vrcp.f32 %v1571_v31 }
 0x896   : > { %v1575_v32 = vpop.permute.xlu1 %1574 }
 0x897   : > { %2107 = vmatpush3.msra.mxu0 %v1575_v32 }
 0x8a0   : > { %v2256_v33 = vpop.eup %2255 }
 0x8a1   : > { %v1573_v34 = vmul.f32 %v2256_v33, %v2254_v26 }
 0x8a3   : > { %2109 = vmatmul.mubr.msk.f32.vlgmr.msra.gmra.mxu0 %vm770_vm2, %v1573_v34 }
 0x963   : > { %v1646_v35 = vpop.f32.mrf.mxu0 }
 0x964   : > { %2114 = vmatmul.mubr.msk.f32.vlgmr.msra.gmra.mxu1 %vm770_vm2, %v1646_v35 }
 0x965   : > { %v2110_v20 = vpop.f32.mrf.mxu0 }
 0xa24   : > { %v1720_v36 = vpop.f32.mrf.mxu1 }
 0xa25   : > { %v1724_v38 = vadd.f32 %v1720_v36, %v1484_v29 }
 0xa26   : > { %v2115_v39 = vpop.f32.mrf.mxu1 }
 0xa27   : > { %v1732_v40 = vadd.f32 %v1979_v37, %v1724_v38 }
 0xa29   : > { %1733 = vst.msk [vmem:[%s533_s30] sm:$0xff] %vm542_vm1, %v1732_v40 }
 0xa2a   : > { %2486 = shalt.err (!%p2483_p12)
}
 0xa2b   : > { %s2487_s5 = scalar_lea.hbm %s1747_s20, 128  ;;  %s2491_s21 = scalar_lea.hbm %s3096_s9, 256 }
 0xa2c   : > { %p2488_p1 = scmp.ne.s32.totalorder %s1747_s20, %s2487_s5  ;;  %p2492_p9 = scmp.lt.s32.totalorder %s1747_s20, %s3096_s9 }
 0xa2d   : > { %p2493_p11 = scmp.lt.s32.totalorder %s2491_s21, %s2487_s5 }
 0xa2e   : > { %p2489_p8 = pnand %p2488_p1, %p3097_p2 }
 0xa2f   : > { %p2494_p13 = por %p2493_p11, %p2492_p9 }
 0xa30   : > { %p2490_p3 = pneg %p2489_p8 }
 0xa32   : > { %p2495_p4 = pnand %p2494_p13, %p2490_p3 }
 0xa34   : > { %2498 = shalt.err (!%p2495_p4)
}
 0xa35   : > { %2140 = dma.vmem_to_hbm [thread:$0]  (%p3097_p2), %s1750_s4, 128, %s1747_s20, %s1735_s18  }
 0xa36 PF: > { %s3098_s17 = sld [smem:[#allocation24_spill]]  ;;  %p3101_p10 = scmp.ge.s32.totalorder %s2573_s14, 2 }
 0xa37   : > { %s3099_s22 = sld [smem:[#allocation26_spill]] }
 0xa3c   : > { %s1761_s1 = sand.u32 1, %s3098_s17  }
 0xa3d   : > { %p3100_p0 = scmp.ne.s32.totalorder %s3099_s22, 0  ;;  %s1762_s25 = scalar_lea.sflag [#allocation4], %s1761_s1 }
 0xa3f   : > { %p2169_p6 = pnand %p3101_p10, %p3100_p0 }
 0xa41   : > { %p2170_p5 = pneg %p2169_p6 }
 0xa43   : > { %2548 = dma.done.wait (%p2170_p5), %s1762_s25, 128  }
 0xa44   : > { %2550 = vsyncadd (%p2170_p5), %s1762_s25, 4294967168  ;;  %s33_s14 = sadd.s32 1, %s2573_s14   ;;  %s3102_s27 = sld [smem:[#allocation28_spill]] }
 0xa45   : > { %p30_p7 = scmp.ge.s32.totalorder %s33_s14, 4   ;;  %s3103_s12 = sld [smem:[#allocation25_spill]] }
 0xa46   : > { %s3104_s13 = sld [smem:[#allocation27_spill]]  ;;  %s3105_s30 = smov %s2557_s10 }
 0xa47   : > { %s3106_s10 = smov %s2561_s11  ;;  %32 = sbr.rel (!%p30_p7) target bundleno = 18 (0x12), region = 154 }
 0xa4a   : > { %s3107_s11 = smov %s3102_s27 }
 0xa4c   :  { %1767 = vsyncpa [#allocation3], 1 }
 0xa4d   :  { %1769 = vsyncpa [#allocation3 + $0x1], 1 }
 0xa4e   :  { %1770 = vsyncpa [#allocation6], 1 }
 0xa4f   :  { %1772 = vsyncpa [#allocation6 + $0x1], 1 }
 0xa50   :  { %1773 = vsyncpa [#allocation9], 1 }
 0xa51   :  { %1775 = vsyncpa [#allocation9 + $0x1], 1 }
 0xa52   :  { %1776 = vsyncpa [#allocation12], 1 }
 0xa53   :  { %1777 = vsyncpa [#allocation15], 1 }
 0xa54   :  { %1778 = vsyncpa [#allocation4], 1 }
 0xa55   :  { %1780 = vsyncpa [#allocation4 + $0x1], 1 }

</bundles_post_ra>
